<compile_context>
chip_gen: v6e
topology: v6e:2x2x1
jax: 0.10.0
libtpu: 0.0.40
codegen_flags: <defaults>
</compile_context>

<pallas_src>
import functools

import jax
import jax.numpy as jnp
from jax import lax
from jax.experimental import pallas as pl
from jax.experimental.pallas import tpu as pltpu


def _gather_rows_kernel(tok_ref, emb_hbm, out_ref, row_buf, sem, *, tg):
    """Gather `tg` embedding rows for this grid step via async row DMAs.

    tok_ref : (n_pad,)      int32 token ids in SMEM (scalar prefetch)
    emb_hbm : (V, E_pad)    embedding table, raw HBM ref (memory_space=pl.ANY)
    out_ref : (tg, E_pad)   output tile in VMEM
    row_buf : (tg, E_pad)   VMEM scratch that the row DMAs land in
    sem     : ()            DMA semaphore shared by the tile's row copies
    """
    base = pl.program_id(0) * tg

    # Issue all row DMAs for this tile (HBM row -> VMEM scratch row).
    def _start(j, carry):
        row = tok_ref[base + j]
        pltpu.make_async_copy(emb_hbm.at[row], row_buf.at[j], sem).start()
        return carry

    lax.fori_loop(0, tg, _start, 0)

    # Wait for all of them (one matching wait per issued copy; the src index in
    # the reconstructed descriptor is irrelevant for the wait).
    def _wait(j, carry):
        pltpu.make_async_copy(emb_hbm.at[0], row_buf.at[j], sem).wait()
        return carry

    lax.fori_loop(0, tg, _wait, 0)

    # Lane-dense vector writeback of the gathered tile.
    out_ref[...] = row_buf[...]


def token_embedding(tokens, embedding_table, *, tg=256):
    """Pallas equivalent of nn.Embedding(vocab, emb)(tokens.long())."""
    orig_shape = tokens.shape
    v, e = embedding_table.shape

    # Keep the output last dim lane-dense: pad embedding columns to x128.
    e_pad = ((e + 127) // 128) * 128
    if e_pad != e:
        embedding_table = jnp.pad(embedding_table, ((0, 0), (0, e_pad - e)))

    tok_flat = tokens.reshape(-1).astype(jnp.int32)
    # PyTorch nn.Embedding raises on out-of-range ids; here we clamp so the DMA
    # source address is always in-bounds (documented semantic difference).
    tok_flat = jnp.clip(tok_flat, 0, v - 1)
    n = tok_flat.shape[0]

    # Token tile: multiple of 8 sublanes, no larger than the (padded) workload.
    tg = max(8, min(tg, ((n + 7) // 8) * 8))
    n_pad = ((n + tg - 1) // tg) * tg
    if n_pad != n:
        tok_flat = jnp.pad(tok_flat, (0, n_pad - n))  # padded ids gather row 0

    kernel = functools.partial(_gather_rows_kernel, tg=tg)

    out = pl.pallas_call(
        kernel,
        out_shape=jax.ShapeDtypeStruct((n_pad, e_pad), embedding_table.dtype),
        grid_spec=pltpu.PrefetchScalarGridSpec(
            num_scalar_prefetch=1,               # token ids -> SMEM
            grid=(n_pad // tg,),
            in_specs=[
                pl.BlockSpec(memory_space=pl.ANY),   # table stays in HBM
            ],
            out_specs=pl.BlockSpec((tg, e_pad), lambda i, tok: (i, 0)),
            scratch_shapes=[
                pltpu.VMEM((tg, e_pad), embedding_table.dtype),
                pltpu.SemaphoreType.DMA(()),
            ],
        ),
        compiler_params=pltpu.CompilerParams(
            dimension_semantics=("parallel",),   # token tiles are independent
        ),
    )(tok_flat, embedding_table)

    out = out[:n, :e]
    return out.reshape(*orig_shape, e)


if __name__ == "__main__":
    vocab_size = 32
    embedding_size = 128
    batch, seq = 2, 8

    key = jax.random.PRNGKey(0)
    k_tok, k_emb = jax.random.split(key)

    # Deterministic parameter init (nn.Embedding default: N(0, 1)).
    embedding_table = jax.random.normal(
        k_emb, (vocab_size, embedding_size), dtype=jnp.float32
    )
    tokens = jax.random.randint(
        k_tok, (batch, seq), minval=0, maxval=vocab_size, dtype=jnp.int32
    )

    out = token_embedding(tokens, embedding_table)
    out = jax.block_until_ready(out)

    # Reference: plain gather (what nn.Embedding does).
    ref = jnp.take(embedding_table, tokens, axis=0)
    assert out.shape == (batch, seq, embedding_size)
    assert out.dtype == jnp.float32
    assert jnp.allclose(out, ref, atol=1e-6), "mismatch vs reference gather"

    print("KERNEL_OK")
</pallas_src>

<mosaic_0001>
module attributes {stable_mosaic.version = 11 : i64} {
  func.func @_gather_rows_kernel(%arg0: i32, %arg1: memref<16xi32, #tpu.memory_space<smem>>, %arg2: memref<32x128xf32, #tpu.memory_space<any>>, %arg3: memref<16x128xf32, #tpu.memory_space<vmem>>, %arg4: memref<16x128xf32, #tpu.memory_space<vmem>>, %arg5: memref<!tpu.dma_semaphore, #tpu.memory_space<semaphore_mem>>) attributes {dimension_semantics = [#tpu.dimension_semantics<parallel>], iteration_bounds = array<i64: 1>, scalar_prefetch = 1 : i64, scratch_operands = 2 : i64, tpu.core_type = #tpu.core_type<tc>, window_params = [{}, {transform_indices = @transform_1, window_bounds = array<i64: 16, 128>}]} {
    %c16_i32 = arith.constant 16 : i32
    %0 = arith.muli %arg0, %c16_i32 : i32
    %c0_i32 = arith.constant 0 : i32
    %c16_i32_0 = arith.constant 16 : i32
    %1 = arith.addi %c0_i32, %c16_i32_0 : i32
    %c1_i32 = arith.constant 1 : i32
    scf.for %arg6 = %c0_i32 to %1 step %c1_i32  : i32 {
      %5 = arith.addi %0, %arg6 : i32
      %6 = arith.index_cast %5 : i32 to index
      %7 = memref.load %arg1[%6] : memref<16xi32, #tpu.memory_space<smem>>
      %c0_i32_9 = arith.constant 0 : i32
      %8 = tpu.memref_slice %arg2[%7, %c0_i32_9] : memref<32x128xf32, #tpu.memory_space<any>> -> memref<1x128xf32, #tpu.memory_space<any>>
      %9 = tpu.memref_squeeze %8 : memref<1x128xf32, #tpu.memory_space<any>> -> memref<128xf32, #tpu.memory_space<any>>
      %c0_i32_10 = arith.constant 0 : i32
      %10 = tpu.memref_slice %arg4[%arg6, %c0_i32_10] : memref<16x128xf32, #tpu.memory_space<vmem>> -> memref<1x128xf32, #tpu.memory_space<vmem>>
      %11 = tpu.memref_squeeze %10 : memref<1x128xf32, #tpu.memory_space<vmem>> -> memref<128xf32, #tpu.memory_space<vmem>>
      tpu.enqueue_dma source(%9 : memref<128xf32, #tpu.memory_space<any>>) target(%11 : memref<128xf32, #tpu.memory_space<vmem>>) target_semaphore(%arg5 : memref<!tpu.dma_semaphore, #tpu.memory_space<semaphore_mem>>)
    }
    %c16_i32_1 = arith.constant 16 : i32
    %c0_i32_2 = arith.constant 0 : i32
    %c16_i32_3 = arith.constant 16 : i32
    %2 = arith.addi %c0_i32_2, %c16_i32_3 : i32
    %c1_i32_4 = arith.constant 1 : i32
    scf.for %arg6 = %c0_i32_2 to %2 step %c1_i32_4  : i32 {
      %c0_i32_9 = arith.constant 0 : i32
      %c0_i32_10 = arith.constant 0 : i32
      %5 = tpu.memref_slice %arg2[%c0_i32_9, %c0_i32_10] : memref<32x128xf32, #tpu.memory_space<any>> -> memref<1x128xf32, #tpu.memory_space<any>>
      %6 = tpu.memref_squeeze %5 : memref<1x128xf32, #tpu.memory_space<any>> -> memref<128xf32, #tpu.memory_space<any>>
      %c0_i32_11 = arith.constant 0 : i32
      %7 = tpu.memref_slice %arg4[%arg6, %c0_i32_11] : memref<16x128xf32, #tpu.memory_space<vmem>> -> memref<1x128xf32, #tpu.memory_space<vmem>>
      %8 = tpu.memref_squeeze %7 : memref<1x128xf32, #tpu.memory_space<vmem>> -> memref<128xf32, #tpu.memory_space<vmem>>
      tpu.wait_dma2 semaphore(%arg5 : memref<!tpu.dma_semaphore, #tpu.memory_space<semaphore_mem>>) src(%6 : memref<128xf32, #tpu.memory_space<any>>) dst(%8 : memref<128xf32, #tpu.memory_space<vmem>>)
    }
    %c16_i32_5 = arith.constant 16 : i32
    %c0 = arith.constant 0 : index
    %c0_6 = arith.constant 0 : index
    %3 = vector.load %arg4[%c0, %c0_6] : memref<16x128xf32, #tpu.memory_space<vmem>>, vector<16x128xf32>
    %c0_7 = arith.constant 0 : index
    %c0_8 = arith.constant 0 : index
    %4 = vector.load %arg3[%c0_7, %c0_8] : memref<16x128xf32, #tpu.memory_space<vmem>>, vector<16x128xf32>
    tpu.vector_store %arg3[%c0_7, %c0_8], %3 {strides = array<i32>} : memref<16x128xf32, #tpu.memory_space<vmem>>, vector<16x128xf32>,
    return
  }
  func.func @transform_1(%arg0: i32, %arg1: memref<16xi32, #tpu.memory_space<smem>>) -> (i32, i32) {
    %c0_i32 = arith.constant 0 : i32
    %c0_i32_0 = arith.constant 0 : i32
    return %arg0, %c0_i32 : i32, i32
  }
}

</mosaic_0001>

<bundles_post_ra>
// kernel: tpu_custom_call.1
= control target key start
LH: loop header
LB: loop body
LE: loop exit
PB: predicated region body
PF: predicated region fallthrough
CT: control target
= control target key end

     0   :  { %s176_s9 = smov [#allocation5]   ;;  %s221_s0 = inlined_call_operand.hbm [shape: s32[16], index: 0, kind: input, shape index: {}]   ;;  %s222_s1 = inlined_call_operand.hbm [shape: f32[32,128], index: 1, kind: input, shape index: {}]   ;;  %s223_s2 = inlined_call_operand.hbm [shape: f32[16,128], index: 2, kind: output, shape index: {}]  }
   0x1   :  { %8 = dma.hbm_to_smem %s221_s0, 16, %s176_s9, [#allocation4] }
   0x2   :  { %162 = dma.done.wait [#allocation4], 16 }
   0x3   :  { %163 = vsyncadd [#allocation4], 4294967280 }
   0x4   :  { %10 = sfence }
   0x5   :  { %11 = vsyncpa [#allocation7], 0  ;;  %s199_s12 = smov 0  }
   0x6 LB: > { %s20_s13 = sld [smem:[#allocation5 + %s170_s12]]  ;;  %s23_s14 = scalar_lea.vmem [#allocation2], %s170_s12  ;;  %s170_s12 = sphi %s199_s12, %s18_s12  }
   0x7   : > { %s31_s15 = sshll.u32 %s23_s14, 4  ;;  %s114_s22 = scalar_lea.hbm %s222_s1, 512  ;;  %s32_s15 = int_to_ptr.vmem [resolvable:$true] %s31_s15 }
   0xc   : > { %s82_s16 = sshll.u32 %s20_s13, 4 }
   0xd   : > { %s22_s18 = scalar_lea.hbm %s222_s1, %s82_s16 }
   0xe   : > { %s112_s19 = scalar_lea.hbm %s22_s18, 16  ;;  %p115_p1 = scmp.lt.s32.totalorder %s22_s18, %s222_s1 }
   0xf   : > { %p113_p0 = scmp.ne.s32.totalorder %s22_s18, %s112_s19  ;;  %p116_p2 = scmp.lt.s32.totalorder %s114_s22, %s112_s19 }
  0x11   : > { %p117_p3 = por %p116_p2, %p115_p1 }
  0x13   : > { %p118_p4 = pnand %p117_p3, %p113_p0 }
  0x15   : > { %121 = shalt.err (!%p118_p4)  }
  0x16   : > { %s122_s25 = scalar_lea.vmem %s32_s15, 16  ;;  %s177_s26 = smov [#allocation2]  }
  0x17   : > { %p123_p5 = scmp.ne.s32.totalorder %s32_s15, %s122_s25  ;;  %s124_s27 = sshll.u32 %s177_s26, 4  ;;  %s125_s27 = int_to_ptr.vmem [resolvable:$false] %s124_s27 }
  0x18   : > { %s126_s28 = scalar_lea.vmem %s125_s27, 256  ;;  %p127_p6 = scmp.lt.s32.totalorder %s32_s15, %s125_s27 }
  0x19   : > { %p128_p7 = scmp.lt.s32.totalorder %s126_s28, %s122_s25 }
  0x1b   : > { %p129_p8 = por %p128_p7, %p127_p6 }
  0x1d   : > { %p130_p9 = pnand %p129_p8, %p123_p5 }
  0x1f   : > { %133 = shalt.err (!%p130_p9)  }
  0x20   : > { %34 = dma.hbm_to_vmem [thread:$0]  %s22_s18, 16, %s32_s15, [#allocation3] }
  0x21   : > { %s18_s12 = sadd.s32 1, %s170_s12  }
  0x22   : > { %p15_p10 = scmp.ge.s32.totalorder %s18_s12, 16  }
  0x23   :  { %s172_s29 = smov (%p15_p10), 0  }
  0x24   :  { %17 = sbr.rel (!%p15_p10) target bundleno = 6 (0x6), region = 40 }
  0x29 LB: > { %164 = dma.done.wait [#allocation3], 16  ;;  %s174_s29 = sphi %s172_s29, %s40_s29  }
  0x2a   : > { %165 = vsyncadd [#allocation3], 4294967280  ;;  %s40_s29 = sadd.s32 1, %s174_s29  }
  0x2b   : > { %p37_p11 = scmp.ge.s32.totalorder %s40_s29, 16  }
  0x2c   :  { %v43_v0 = vld [vmem:[#allocation2] sm:$0xff] (%p37_p11)  ;;  %v44_v1 = vld [vmem:[#allocation2 + $0x8] sm:$0xff] (%p37_p11)  ;;  %s178_s30 = smov (%p37_p11), [#allocation6]  }
  0x2d   :  { %39 = sbr.rel (!%p37_p11) target bundleno = 41 (0x29), region = 51  ;;  %45 = vst [vmem:[#allocation6] sm:$0xff] (%p37_p11), %v43_v0  ;;  %46 = vst [vmem:[#allocation6 + $0x8] sm:$0xff] (%p37_p11), %v44_v1  ;;  %s52_s3 = sshll.u32 (%p37_p11), %s178_s30, 4  ;;  %s53_s3 = int_to_ptr.vmem [resolvable:$true] %s52_s3 }
  0x2e   :  { %s134_s4 = scalar_lea.vmem (%p37_p11), %s53_s3, 256  ;;  %p139_p13 = scmp.lt.s32.totalorder (%p37_p11), %s53_s3, %s53_s3 }
  0x2f   :  { %p135_p12 = scmp.ne.s32.totalorder (%p37_p11), %s53_s3, %s134_s4  ;;  %p140_p0 = scmp.lt.s32.totalorder (%p37_p11), %s134_s4, %s134_s4 }
  0x31   :  { %p141_p1 = por (%p37_p11), %p140_p0, %p139_p13 }
  0x33   :  { %p142_p2 = pnand %p141_p1, %p135_p12 }
  0x35   :  { %145 = shalt.err (!%p142_p2)
}
  0x36   :  { %s179_s1 = smov 128   ;;  %s180_s5 = smov 8  }
  0x37   :  { %58 = dma.vmem_to_hbm [thread:$0]  %s53_s3, 256, %s223_s2, [#allocation7], %s179_s1, %s179_s1, %s180_s5  }
  0x38   :  { %166 = dma.done.wait [#allocation7], 256  }
  0x39   :  { %167 = vsyncadd [#allocation7], 4294967040 }
  0x3a   :  { %62 = vsyncpa [#allocation7], 1 }
  0x3b   :  { %63 = vsyncmov [#allocation3] }
  0x3e   :  { %s64_s8 = vpop.sfrf %63 }
  0x3f   :  { %p83_p3 = scmp.ne.s32.totalorder %s64_s8, 0 }
  0x41   :  { %68 = shalt.err (%p83_p3)  }

</bundles_post_ra>
